<compile_context>
chip_gen: v7x
topology: tpu7x:2x2x1
jax: 0.10.0
libtpu: 0.0.40
codegen_flags: <defaults>
</compile_context>

<pallas_src>
import functools

import jax
import jax.numpy as jnp
from jax.experimental import pallas as pl
from jax.experimental.pallas import tpu as pltpu

_HIDDEN = 64
_LANE = 128
_SUBLANE = 16  # covers both f32 (8) and bf16 (16) sublane packing


def qnetwork_kernel(x_ref, w1_ref, b1_ref, w2_ref, b2_ref, w3_ref, b3_ref, out_ref):
    """Fused 3-layer MLP for one batch tile: relu(relu(x@W1+b1)@W2+b2)@W3+b3."""
    x = x_ref[...]  # [TB, S], compute dtype (bf16 or f32)

    # Layer 1: MXU matmul with f32 accumulation, bias add + ReLU on the VPU.
    h1 = jnp.dot(x, w1_ref[...], preferred_element_type=jnp.float32) + b1_ref[...]
    h1 = jnp.maximum(h1, 0.0)

    # Layer 2
    h2 = jnp.dot(h1.astype(w2_ref.dtype), w2_ref[...],
                 preferred_element_type=jnp.float32) + b2_ref[...]
    h2 = jnp.maximum(h2, 0.0)

    # Layer 3 (output lanes padded to 128 for unmasked, lane-dense stores)
    h3 = jnp.dot(h2.astype(w3_ref.dtype), w3_ref[...],
                 preferred_element_type=jnp.float32) + b3_ref[...]
    out_ref[...] = h3.astype(out_ref.dtype)


def _round_up(x, m):
    return ((x + m - 1) // m) * m


def qnetwork_forward(state, params, *, compute_dtype=jnp.bfloat16, block_b=1024):
    """QNetwork forward pass via a batch-tiled, pipelined Pallas kernel.

    state: [B, state_size] float32
    params: dict with w1 [S,64], b1 [1,64], w2 [64,64], b2 [1,64],
            w3 [64,A], b3 [1,A]   (weights pre-transposed to [in, out])
    returns: [B, A] float32 action values
    """
    B, S = state.shape
    A = params["w3"].shape[1]

    # ---- padding: lane-dense output, sublane-aligned batch tile -------------
    A_pad = _round_up(A, _LANE)
    B_aligned = _round_up(max(B, _SUBLANE), _SUBLANE)
    TB = min(block_b, B_aligned)          # batch tile (multiple of 16)
    B_pad = _round_up(B_aligned, TB)
    n_tiles = pl.cdiv(B_pad, TB)

    x = state.astype(compute_dtype)
    if B_pad != B:
        x = jnp.pad(x, ((0, B_pad - B), (0, 0)))

    w1 = params["w1"].astype(compute_dtype)
    w2 = params["w2"].astype(compute_dtype)
    w3 = jnp.pad(params["w3"], ((0, 0), (0, A_pad - A))).astype(compute_dtype)
    b1 = params["b1"].astype(jnp.float32)          # biases stay f32 (added post-acc)
    b2 = params["b2"].astype(jnp.float32)
    b3 = jnp.pad(params["b3"], ((0, 0), (0, A_pad - A))).astype(jnp.float32)

    resident = lambda i: (0, 0)   # weights/biases: same block every grid step

    out_pad = pl.pallas_call(
        qnetwork_kernel,
        out_shape=jax.ShapeDtypeStruct((B_pad, A_pad), jnp.float32),
        grid=(n_tiles,),
        in_specs=[
            pl.BlockSpec((TB, S), lambda i: (i, 0)),          # state tile (pipelined)
            pl.BlockSpec((S, _HIDDEN), resident),             # w1
            pl.BlockSpec((1, _HIDDEN), resident),             # b1
            pl.BlockSpec((_HIDDEN, _HIDDEN), resident),       # w2
            pl.BlockSpec((1, _HIDDEN), resident),             # b2
            pl.BlockSpec((_HIDDEN, A_pad), resident),         # w3 (lane-padded)
            pl.BlockSpec((1, A_pad), resident),               # b3 (lane-padded)
        ],
        out_specs=pl.BlockSpec((TB, A_pad), lambda i: (i, 0)),
        compiler_params=pltpu.CompilerParams(
            dimension_semantics=("parallel",),     # megacore sharding on v7x
            vmem_limit_bytes=32 * 1024 * 1024,     # safe on v7x's 64 MiB VMEM
        ),
    )(x, w1, b1, w2, b2, w3, b3)

    return out_pad[:B, :A]


def init_qnetwork_params(key, state_size, action_size):
    """torch.nn.Linear-style init: U(-1/sqrt(fan_in), 1/sqrt(fan_in)).

    Weights are stored transposed ([in, out]) relative to PyTorch's [out, in]
    so the kernel computes x @ W directly on the MXU.
    """
    def linear(k, fan_in, fan_out):
        kw, kb = jax.random.split(k)
        bound = 1.0 / jnp.sqrt(jnp.float32(fan_in))
        w = jax.random.uniform(kw, (fan_in, fan_out), jnp.float32, -bound, bound)
        b = jax.random.uniform(kb, (1, fan_out), jnp.float32, -bound, bound)
        return w, b

    k1, k2, k3 = jax.random.split(key, 3)
    w1, b1 = linear(k1, state_size, _HIDDEN)
    w2, b2 = linear(k2, _HIDDEN, _HIDDEN)
    w3, b3 = linear(k3, _HIDDEN, action_size)
    return {"w1": w1, "b1": b1, "w2": w2, "b2": b2, "w3": w3, "b3": b3}


def qnetwork_reference(state, params):
    """Pure-JAX f32 reference for correctness checking."""
    h1 = jnp.maximum(state @ params["w1"] + params["b1"], 0.0)
    h2 = jnp.maximum(h1 @ params["w2"] + params["b2"], 0.0)
    return h2 @ params["w3"] + params["b3"]


if __name__ == "__main__":
    key = jax.random.PRNGKey(0)
    k_params, k_state = jax.random.split(key)

    batch = 2
    state_size = 8
    action_size = 4

    params = init_qnetwork_params(k_params, state_size, action_size)
    state = jax.random.normal(k_state, (batch, state_size), jnp.float32)
    ref = qnetwork_reference(state, params)

    # Exact-precision path (f32 compute) — tight check.
    out_f32 = qnetwork_forward(state, params, compute_dtype=jnp.float32)
    out_f32 = jax.block_until_ready(out_f32)
    assert out_f32.shape == (batch, action_size)
    assert jnp.allclose(out_f32, ref, atol=1e-5, rtol=1e-5), "f32 mismatch vs reference"

    # Default fast path (bf16 storage/compute, f32 accumulation) — loose check.
    out_bf16 = qnetwork_forward(state, params)
    out_bf16 = jax.block_until_ready(out_bf16)
    assert out_bf16.shape == (batch, action_size)
    assert jnp.allclose(out_bf16, ref, atol=5e-2, rtol=5e-2), "bf16 mismatch vs reference"

    print("KERNEL_OK")
</pallas_src>

<mosaic_0001>
module attributes {stable_mosaic.version = 11 : i64} {
  func.func @qnetwork_kernel(%arg0: i32, %arg1: memref<16x8xf32, #tpu.memory_space<vmem>>, %arg2: memref<8x64xf32, #tpu.memory_space<vmem>>, %arg3: memref<1x64xf32, #tpu.memory_space<vmem>>, %arg4: memref<64x64xf32, #tpu.memory_space<vmem>>, %arg5: memref<1x64xf32, #tpu.memory_space<vmem>>, %arg6: memref<64x128xf32, #tpu.memory_space<vmem>>, %arg7: memref<1x128xf32, #tpu.memory_space<vmem>>, %arg8: memref<16x128xf32, #tpu.memory_space<vmem>>) attributes {dimension_semantics = [#tpu.dimension_semantics<parallel>], iteration_bounds = array<i64: 1>, scalar_prefetch = 0 : i64, scratch_operands = 0 : i64, tpu.core_type = #tpu.core_type<tc>, window_params = [{transform_indices = @transform_0, window_bounds = array<i64: 16, 8>}, {pipeline_mode = #tpu.pipeline_mode<synchronous>, transform_indices = @transform_1, window_bounds = array<i64: 8, 64>}, {pipeline_mode = #tpu.pipeline_mode<synchronous>, transform_indices = @transform_2, window_bounds = array<i64: 1, 64>}, {pipeline_mode = #tpu.pipeline_mode<synchronous>, transform_indices = @transform_3, window_bounds = array<i64: 64, 64>}, {pipeline_mode = #tpu.pipeline_mode<synchronous>, transform_indices = @transform_4, window_bounds = array<i64: 1, 64>}, {pipeline_mode = #tpu.pipeline_mode<synchronous>, transform_indices = @transform_5, window_bounds = array<i64: 64, 128>}, {pipeline_mode = #tpu.pipeline_mode<synchronous>, transform_indices = @transform_6, window_bounds = array<i64: 1, 128>}, {transform_indices = @transform_7, window_bounds = array<i64: 16, 128>}]} {
    %c0 = arith.constant 0 : index
    %c0_0 = arith.constant 0 : index
    %0 = vector.load %arg1[%c0, %c0_0] : memref<16x8xf32, #tpu.memory_space<vmem>>, vector<16x8xf32>
    %c0_1 = arith.constant 0 : index
    %c0_2 = arith.constant 0 : index
    %1 = vector.load %arg2[%c0_1, %c0_2] : memref<8x64xf32, #tpu.memory_space<vmem>>, vector<8x64xf32>
    %cst = arith.constant dense<0.000000e+00> : vector<16x64xf32>
    %2 = tpu.matmul %0, %1, %cst {dimension_numbers = #tpu.dot_dimension_numbers<[1], [0], [0], [1], [0, 0, 1, 1], [], []>} : vector<16x8xf32>, vector<8x64xf32>, vector<16x64xf32> -> vector<16x64xf32>
    %c0_3 = arith.constant 0 : index
    %c0_4 = arith.constant 0 : index
    %3 = vector.load %arg3[%c0_3, %c0_4] : memref<1x64xf32, #tpu.memory_space<vmem>>, vector<1x64xf32>
    %4 = vector.broadcast %3 : vector<1x64xf32> to vector<16x64xf32>
    %5 = arith.addf %2, %4 : vector<16x64xf32>
    %cst_5 = arith.constant 0.000000e+00 : f32
    %6 = vector.broadcast %cst_5 : f32 to vector<16x64xf32>
    %7 = arith.maximumf %5, %6 : vector<16x64xf32>
    %c0_6 = arith.constant 0 : index
    %c0_7 = arith.constant 0 : index
    %8 = vector.load %arg4[%c0_6, %c0_7] : memref<64x64xf32, #tpu.memory_space<vmem>>, vector<64x64xf32>
    %cst_8 = arith.constant dense<0.000000e+00> : vector<16x64xf32>
    %9 = tpu.matmul %7, %8, %cst_8 {dimension_numbers = #tpu.dot_dimension_numbers<[1], [0], [0], [1], [0, 0, 1, 1], [], []>} : vector<16x64xf32>, vector<64x64xf32>, vector<16x64xf32> -> vector<16x64xf32>
    %c0_9 = arith.constant 0 : index
    %c0_10 = arith.constant 0 : index
    %10 = vector.load %arg5[%c0_9, %c0_10] : memref<1x64xf32, #tpu.memory_space<vmem>>, vector<1x64xf32>
    %11 = vector.broadcast %10 : vector<1x64xf32> to vector<16x64xf32>
    %12 = arith.addf %9, %11 : vector<16x64xf32>
    %cst_11 = arith.constant 0.000000e+00 : f32
    %13 = vector.broadcast %cst_11 : f32 to vector<16x64xf32>
    %14 = arith.maximumf %12, %13 : vector<16x64xf32>
    %c0_12 = arith.constant 0 : index
    %c0_13 = arith.constant 0 : index
    %15 = vector.load %arg6[%c0_12, %c0_13] : memref<64x128xf32, #tpu.memory_space<vmem>>, vector<64x128xf32>
    %cst_14 = arith.constant dense<0.000000e+00> : vector<16x128xf32>
    %16 = tpu.matmul %14, %15, %cst_14 {dimension_numbers = #tpu.dot_dimension_numbers<[1], [0], [0], [1], [0, 0, 1, 1], [], []>} : vector<16x64xf32>, vector<64x128xf32>, vector<16x128xf32> -> vector<16x128xf32>
    %c0_15 = arith.constant 0 : index
    %c0_16 = arith.constant 0 : index
    %17 = vector.load %arg7[%c0_15, %c0_16] : memref<1x128xf32, #tpu.memory_space<vmem>>, vector<1x128xf32>
    %18 = vector.broadcast %17 : vector<1x128xf32> to vector<16x128xf32>
    %19 = arith.addf %16, %18 : vector<16x128xf32>
    %c0_17 = arith.constant 0 : index
    %c0_18 = arith.constant 0 : index
    %20 = vector.load %arg8[%c0_17, %c0_18] : memref<16x128xf32, #tpu.memory_space<vmem>>, vector<16x128xf32>
    tpu.vector_store %arg8[%c0_17, %c0_18], %19 {strides = array<i32>} : memref<16x128xf32, #tpu.memory_space<vmem>>, vector<16x128xf32>,
    return
  }
  func.func @transform_0(%arg0: i32) -> (i32, i32) {
    %c0_i32 = arith.constant 0 : i32
    %c0_i32_0 = arith.constant 0 : i32
    return %arg0, %c0_i32 : i32, i32
  }
  func.func @transform_1(%arg0: i32) -> (i32, i32) {
    %c0_i32 = arith.constant 0 : i32
    %c0_i32_0 = arith.constant 0 : i32
    %c0_i32_1 = arith.constant 0 : i32
    return %c0_i32, %c0_i32_0 : i32, i32
  }
  func.func @transform_2(%arg0: i32) -> (i32, i32) {
    %c0_i32 = arith.constant 0 : i32
    %c0_i32_0 = arith.constant 0 : i32
    %c0_i32_1 = arith.constant 0 : i32
    return %c0_i32, %c0_i32_0 : i32, i32
  }
  func.func @transform_3(%arg0: i32) -> (i32, i32) {
    %c0_i32 = arith.constant 0 : i32
    %c0_i32_0 = arith.constant 0 : i32
    %c0_i32_1 = arith.constant 0 : i32
    return %c0_i32, %c0_i32_0 : i32, i32
  }
  func.func @transform_4(%arg0: i32) -> (i32, i32) {
    %c0_i32 = arith.constant 0 : i32
    %c0_i32_0 = arith.constant 0 : i32
    %c0_i32_1 = arith.constant 0 : i32
    return %c0_i32, %c0_i32_0 : i32, i32
  }
  func.func @transform_5(%arg0: i32) -> (i32, i32) {
    %c0_i32 = arith.constant 0 : i32
    %c0_i32_0 = arith.constant 0 : i32
    %c0_i32_1 = arith.constant 0 : i32
    return %c0_i32, %c0_i32_0 : i32, i32
  }
  func.func @transform_6(%arg0: i32) -> (i32, i32) {
    %c0_i32 = arith.constant 0 : i32
    %c0_i32_0 = arith.constant 0 : i32
    %c0_i32_1 = arith.constant 0 : i32
    return %c0_i32, %c0_i32_0 : i32, i32
  }
  func.func @transform_7(%arg0: i32) -> (i32, i32) {
    %c0_i32 = arith.constant 0 : i32
    %c0_i32_0 = arith.constant 0 : i32
    return %arg0, %c0_i32 : i32, i32
  }
}

</mosaic_0001>

<bundles_post_ra>
// kernel: tpu_custom_call.1
= control target key start
LH: loop header
LB: loop body
LE: loop exit
PB: predicated region body
PF: predicated region fallthrough
CT: control target
= control target key end

     0   :  { %12 = vsyncpa [#allocation3], 0  ;;  %s660_s0 = inlined_call_operand.vmem [shape: f32[16,8], index: 0, kind: input, shape index: {}]   ;;  %s661_s1 = inlined_call_operand.vmem [shape: f32[8,64], index: 1, kind: input, shape index: {}]   ;;  %s662_s2 = inlined_call_operand.vmem [shape: f32[1,64], index: 2, kind: input, shape index: {}]   ;;  %s663_s3 = inlined_call_operand.hbm [shape: f32[64,64], index: 3, kind: input, shape index: {}]   ;;  %s664_s4 = inlined_call_operand.vmem [shape: f32[1,64], index: 4, kind: input, shape index: {}]   ;;  %s665_s5 = inlined_call_operand.hbm [shape: f32[64,128], index: 5, kind: input, shape index: {}]   ;;  %s666_s6 = inlined_call_operand.vmem [shape: f32[1,128], index: 6, kind: input, shape index: {}]   ;;  %s667_s7 = inlined_call_operand.hbm [shape: f32[16,128], index: 7, kind: output, shape index: {}]  }
   0x1   :  { %13 = vsyncpa [#allocation6], 0 }
   0x2   :  { %14 = vsyncpa [#allocation4], 0  ;;  %s548_s24 = smov [#allocation2]   ;;  %s476_s28 = scalar_lea.hbm %s663_s3, 1024 }
   0x3   :  { %s26_s25 = sshll.u32 %s548_s24, 4  ;;  %p477_p0 = scmp.ne.s32.totalorder %s663_s3, %s476_s28  ;;  %s27_s25 = int_to_ptr.vmem [resolvable:$true] %s26_s25 }
   0x4   :  { %p480_p1 = scmp.lt.u32.totalorder %s476_s28, %s663_s3 }
   0x6   :  { %p482_p2 = pnand %p480_p1, %p477_p0 }
   0x8   :  { %485 = shalt.err (!%p482_p2)
}
   0x9   :  { %s486_s10 = scalar_lea.vmem %s27_s25, 1024  ;;  %p491_p4 = scmp.lt.s32.totalorder %s27_s25, %s27_s25 }
   0xa   :  { %p487_p3 = scmp.ne.s32.totalorder %s27_s25, %s486_s10  ;;  %p492_p5 = scmp.lt.s32.totalorder %s486_s10, %s486_s10 }
   0xc   :  { %p493_p6 = por %p492_p5, %p491_p4 }
   0xe   :  { %p494_p7 = pnand %p493_p6, %p487_p3 }
  0x10   :  { %497 = shalt.err (!%p494_p7)
}
  0x11   :  { %s549_s11 = smov 128   ;;  %s550_s12 = smov 8  }
  0x12   :  { %32 = dma.hbm_to_vmem [thread:$0]  %s663_s3, 1024, %s27_s25, [#allocation3], %s549_s11, %s549_s11, %s550_s12  }
  0x13   :  { %s551_s15 = smov [#allocation5]   ;;  %s498_s19 = scalar_lea.hbm %s665_s5, 1024 }
  0x14   :  { %s40_s16 = sshll.u32 %s551_s15, 4  ;;  %p499_p8 = scmp.ne.s32.totalorder %s665_s5, %s498_s19  ;;  %s41_s16 = int_to_ptr.vmem [resolvable:$true] %s40_s16 }
  0x15   :  { %p502_p9 = scmp.lt.u32.totalorder %s498_s19, %s665_s5 }
  0x17   :  { %p504_p10 = pnand %p502_p9, %p499_p8 }
  0x19   :  { %507 = shalt.err (!%p504_p10)
}
  0x1a   :  { %s508_s24 = scalar_lea.vmem %s41_s16, 1024  ;;  %p513_p12 = scmp.lt.s32.totalorder %s41_s16, %s41_s16 }
  0x1b   :  { %p509_p11 = scmp.ne.s32.totalorder %s41_s16, %s508_s24  ;;  %p514_p13 = scmp.lt.s32.totalorder %s508_s24, %s508_s24 }
  0x1d   :  { %p515_p0 = por %p514_p13, %p513_p12 }
  0x1f   :  { %p516_p1 = pnand %p515_p0, %p509_p11 }
  0x21   :  { %519 = shalt.err (!%p516_p1)
}
  0x22   :  { %46 = dma.hbm_to_vmem [thread:$0]  %s665_s5, 1024, %s41_s16, [#allocation6], %s549_s11, %s549_s11, %s550_s12  }
  0x23   :  { %542 = dma.done.wait [#allocation3], 1024  }
  0x24   :  { %543 = vsyncadd [#allocation3], 4294966272 }
  0x25   :  { %544 = dma.done.wait [#allocation6], 1024  }
  0x26   :  { %545 = vsyncadd [#allocation6], 4294966272  ;;  %vm65_vm0 = vcmask 64512   ;;  %v57_v0 = vld [vmem:[%s661_s1] sm:$0xff]  ;;  %v56_v2 = vld [vmem:[%s660_s0 + $0x8] sm:$0xff]  ;;  %vm164_vm1 = vcmask 523264  }
  0x27   :  { %v55_v1 = vld [vmem:[%s660_s0] sm:$0xff]  ;;  %396 = vmatprep.subr.mxu0 %v57_v0  ;;  %v150_v4 = vld [vmem:[#allocation2 + $0x8] sm:$0xff]  ;;  %v151_v5 = vld [vmem:[#allocation2 + $0x10] sm:$0xff]  ;;  %s552_s13 = smov [#allocation7]  }
  0x28   :  { %398 = vmatprep.mubr.msk.f32.mxu0 %vm65_vm0, %v55_v1  ;;  %v149_v3 = vld [vmem:[#allocation2] sm:$0xff]  ;;  %397 = vmatpush3.msra.mxu0 %v57_v0  ;;  %v152_v7 = vld [vmem:[#allocation2 + $0x18] sm:$0xff]  ;;  %v154_v10 = vld [vmem:[#allocation2 + $0x28] sm:$0xff]  ;;  %s351_s14 = sshll.u32 %s552_s13, 4  ;;  %s352_s14 = int_to_ptr.vmem [resolvable:$true] %s351_s14 }
  0x29   :  { %v439_v6 = vpack.c.bf16 %v150_v4, %v149_v3  ;;  %399 = vmatmul.mubr.msk.f32.vlgmr.msra.gmra.mrb[0].mxu0 %vm65_vm0, %v56_v2  ;;  %v443_v8 = vpack.c.bf16 %v152_v7, %v151_v5  ;;  %v153_v9 = vld [vmem:[#allocation2 + $0x20] sm:$0xff]  ;;  %v155_v12 = vld [vmem:[#allocation2 + $0x30] sm:$0xff]  ;;  %v156_v13 = vld [vmem:[#allocation2 + $0x38] sm:$0xff]  ;;  %p525_p3 = scmp.lt.s32.totalorder %s352_s14, %s352_s14 }
  0x2a   :  { %v447_v11 = vpack.c.bf16 %v154_v10, %v153_v9  ;;  %v451_v14 = vpack.c.bf16 %v156_v13, %v155_v12  ;;  %v248_v15 = vld [vmem:[#allocation5] sm:$0xff]  ;;  %v249_v16 = vld [vmem:[#allocation5 + $0x8] sm:$0xff]  ;;  %v250_v17 = vld [vmem:[#allocation5 + $0x10] sm:$0xff] }
  0x2b   :  { %440 = vmatprep.subr.bf16.mxu1 %v439_v6  ;;  %v455_v18 = vpack.c.bf16 %v249_v16, %v248_v15  ;;  %v251_v19 = vld [vmem:[#allocation5 + $0x18] sm:$0xff]  ;;  %v252_v21 = vld [vmem:[#allocation5 + $0x20] sm:$0xff]  ;;  %v253_v22 = vld [vmem:[#allocation5 + $0x28] sm:$0xff] }
  0x2c   :  { %442 = vmatpush3.bf16.msra.mxu1 %v439_v6  ;;  %v459_v20 = vpack.c.bf16 %v251_v19, %v250_v17  ;;  %v463_v23 = vpack.c.bf16 %v253_v22, %v252_v21  ;;  %v364_v24 = vld [vmem:[%s662_s2] ss:$0 sm:$0xff]  ;;  %v254_v31 = vld [vmem:[#allocation5 + $0x30] sm:$0xff]  ;;  %v255_v32 = vld [vmem:[#allocation5 + $0x38] sm:$0xff] }
  0x2d   :  { %444 = vmatprep.subr.bf16.mxu1 %v443_v8  ;;  %456 = vmatprep.subr.bf16.mxu0 %v455_v18  ;;  %v467_v33 = vpack.c.bf16 %v255_v32, %v254_v31  ;;  %v367_v34 = vld [vmem:[%s664_s4] ss:$0 sm:$0xff]  ;;  %s520_s4 = scalar_lea.vmem %s352_s14, 256 }
  0x2e   :  { %458 = vmatpush3.bf16.msra.mxu0 %v455_v18  ;;  %v370_v41 = vld [vmem:[%s666_s6] ss:$0 sm:$0xff]  ;;  %p521_p2 = scmp.ne.s32.totalorder %s352_s14, %s520_s4  ;;  %p526_p4 = scmp.lt.s32.totalorder %s520_s4, %s520_s4 }
  0x2f   :  { %460 = vmatprep.subr.bf16.mxu0 %v459_v20 }
  0x30   :  { %446 = vmatpush3.bf16.msra.mxu1 %v443_v8  ;;  %p527_p5 = por %p526_p4, %p525_p3 }
  0x31   :  { %448 = vmatprep.subr.bf16.mxu1 %v447_v11 }
  0x32   :  { %462 = vmatpush3.bf16.msra.mxu0 %v459_v20  ;;  %p528_p6 = pnand %p527_p5, %p521_p2 }
  0x33   :  { %464 = vmatprep.subr.bf16.mxu0 %v463_v23 }
  0x34   :  { %450 = vmatpush3.bf16.msra.mxu1 %v447_v11 }
  0x35   :  { %452 = vmatprep.subr.bf16.mxu1 %v451_v14 }
  0x36   :  { %466 = vmatpush3.bf16.msra.mxu0 %v463_v23 }
  0x37   :  { %468 = vmatprep.subr.bf16.mxu0 %v467_v33 }
  0x38   :  { %454 = vmatpush3.bf16.msra.mxu1 %v451_v14 }
  0x3a   :  { %470 = vmatpush3.bf16.msra.mxu0 %v467_v33 }
  0xfc   :  { %v400_v25 = vpop.f32.mrb[0].mxu0 }
  0xfd   :  { %v144_v26 = vadd.f32 %v400_v25, %v364_v24  ;;  %v138_v27 = vpop.f32.mrb[1].mxu0 }
  0xfe   :  { %v139_v28 = vadd.f32 %v364_v24, %v138_v27 }
  0xff   :  { %v148_v30 = vmax.f32 %v144_v26, 0.0 }
 0x100   :  { %v147_v29 = vmax.f32 %v139_v28, 0.0 }
 0x102   :  { %417 = vmatprep.mubr.msk.f32.mxu1 %vm164_vm1, %v147_v29 }
 0x103   :  { %418 = vmatmul.mubr.msk.f32.vlgmr.msra.gmra.mrb[0].mxu1 %vm164_vm1, %v148_v30 }
 0x1d6   :  { %v419_v35 = vpop.f32.mrb[0].mxu1 }
 0x1d7   :  { %v243_v36 = vadd.f32 %v419_v35, %v367_v34  ;;  %v237_v37 = vpop.f32.mrb[1].mxu1 }
 0x1d8   :  { %v238_v38 = vadd.f32 %v367_v34, %v237_v37 }
 0x1d9   :  { %v247_v40 = vmax.f32 %v243_v36, 0.0 }
 0x1da   :  { %v246_v39 = vmax.f32 %v238_v38, 0.0 }
 0x1dc   :  { %436 = vmatprep.mubr.msk.f32.mxu0 %vm164_vm1, %v246_v39 }
 0x1dd   :  { %437 = vmatmul.mubr.msk.f32.vlgmr.msra.gmra.mrb[2].mxu0 %vm164_vm1, %v247_v40 }
 0x2b0   :  { %v438_v42 = vpop.f32.mrb[2].mxu0 }
 0x2b1   :  { %v341_v43 = vadd.f32 %v438_v42, %v370_v41  ;;  %v335_v44 = vpop.f32.mrb[3].mxu0 }
 0x2b2   :  { %v336_v45 = vadd.f32 %v370_v41, %v335_v44 }
 0x2b3   :  { %345 = vst [vmem:[#allocation7 + $0x8] sm:$0xff] %v341_v43 }
 0x2b4   :  { %344 = vst [vmem:[#allocation7] sm:$0xff] %v336_v45 }
 0x2b5   :  { %531 = shalt.err (!%p528_p6)
}
 0x2b6   :  { %s532_s6 = scalar_lea.hbm %s667_s7, 256 }
 0x2b7   :  { %p533_p7 = scmp.ne.s32.totalorder %s667_s7, %s532_s6  ;;  %p536_p8 = scmp.lt.u32.totalorder %s532_s6, %s667_s7 }
 0x2b9   :  { %p538_p9 = pnand %p536_p8, %p533_p7 }
 0x2bb   :  { %541 = shalt.err (!%p538_p9)
}
 0x2bc   :  { %357 = dma.vmem_to_hbm [thread:$0]  %s352_s14, 256, %s667_s7, [#allocation4], %s549_s11, %s549_s11, %s550_s12  }
 0x2bd   :  { %546 = dma.done.wait [#allocation4], 256  }
 0x2be   :  { %547 = vsyncadd [#allocation4], 4294967040 }
 0x2bf   :  { %361 = vsyncpa [#allocation3], 1 }
 0x2c0   :  { %362 = vsyncpa [#allocation6], 1 }
 0x2c1   :  { %363 = vsyncpa [#allocation4], 1 }

</bundles_post_ra>
